<compile_context>
chip_gen: v7x
topology: tpu7x:2x2x1
jax: 0.10.0
libtpu: 0.0.40
codegen_flags: <defaults>
</compile_context>

<pallas_src>
import functools

import jax
import jax.numpy as jnp
from jax.experimental import pallas as pl
from jax.experimental.pallas import tpu as pltpu

BN_EPS = 1e-5


def _pe_kernel(x_ref, w1_ref, b1_ref, w2_ref, b2_ref, o_ref):
    # x_ref: (tile_r, pack*3) packed point tile; weights are small full arrays.
    x = x_ref[...].astype(jnp.float32)

    # Conv1d(3->E, k=1) with eval-mode BN folded in (block-diag over `pack`).
    h = jnp.dot(x, w1_ref[...], preferred_element_type=jnp.float32) + b1_ref[...]

    # ReLU
    h = jnp.maximum(h, 0.0)

    # Conv1d(E->E, k=1) (block-diagonal over `pack` points).
    out = jnp.dot(h, w2_ref[...], preferred_element_type=jnp.float32) + b2_ref[...]
    o_ref[...] = out.astype(o_ref.dtype)


def _block_diag(w, pack):
    """(k, e) -> (pack*k, pack*e) block-diagonal replication of w."""
    if pack == 1:
        return w
    k, e = w.shape
    eye = jnp.eye(pack, dtype=w.dtype)
    return (eye[:, None, :, None] * w[None, :, None, :]).reshape(pack * k, pack * e)


def prepare_params(params):
    """One-time host-side weight prep (hoisted out of the per-call path).

    Folds eval-mode BatchNorm + conv1 bias into conv1, picks the lane packing
    factor, and expands weights to block-diagonal / tiled form.
    Returns (pack, packed_weights_dict).
    """
    E = params["w1"].shape[1]
    if E <= 128 and 128 % E == 0:
        pack = 128 // E
    else:
        pack = 1  # TODO(synk): pad E up to a divisor of 128 for odd widths.

    scale = params["gamma"] * jax.lax.rsqrt(params["var"] + BN_EPS)       # (1, E)
    w1f = params["w1"] * scale                                            # (3, E)
    b1f = (params["b1"] - params["mu"]) * scale + params["beta"]          # (1, E)

    packed = {
        "w1": _block_diag(w1f, pack),               # (pack*3, pack*E)
        "b1": jnp.tile(b1f, (1, pack)),             # (1, pack*E)
        "w2": _block_diag(params["w2"], pack),      # (pack*E, pack*E)
        "b2": jnp.tile(params["b2"], (1, pack)),    # (1, pack*E)
    }
    return pack, packed


@functools.partial(jax.jit, static_argnames=("pack", "tile_m", "out_dtype"))
def _pe_forward(xyz, w1b, b1b, w2b, b2b, *, pack, tile_m, out_dtype):
    B, N, C_in = xyz.shape
    Ep = w1b.shape[1]
    E = Ep // pack
    M = B * N
    out_dtype = xyz.dtype if out_dtype is None else out_dtype

    # Pad the point stream to a multiple of `pack` (at most pack-1 dummy
    # points) so the lane-dense packing is always used; slice off at the end.
    pad = (-M) % pack
    x_flat = xyz.reshape(M, C_in)
    if pad:
        x_flat = jnp.concatenate(
            [x_flat, jnp.zeros((pad, C_in), xyz.dtype)], axis=0)
    Mtot = M + pad
    Mp = Mtot // pack
    Cp = C_in * pack

    x2d = x_flat.reshape(Mp, Cp)                    # contiguous, no copy pass

    # Row-tile sizing.  tile_m points per step -> tile_r packed rows.
    # VMEM per packed row (lane-padded, double-buffered, in + f32 out) ~2 KiB:
    #   tile_r=8192  -> ~16 MiB ; cap 12288 -> ~24 MiB (safe on v7x's 64 MiB).
    tile_r = max(8, (tile_m // pack) // 8 * 8)
    tile_r = min(tile_r, 12288)
    if Mp >= 4 * 1024:
        # Keep >= 4 grid steps so the v7x 2-TC megacore always has work.
        tile_r = min(tile_r, max(1024, (Mp // 4) // 8 * 8))
    tile_r = min(tile_r, Mp)                        # full-dim block if Mp small
    grid = (pl.cdiv(Mp, tile_r),)                   # ragged tail handled by Pallas

    # Explicit scoped-VMEM limit (v5e default is only 16 MiB; keep <= 48 MiB
    # so we stay comfortably inside v7x's 64 MiB physical VMEM).
    vmem_est = 2 * tile_r * (128 + 128) * 4 + (1 << 20)
    vmem_limit = int(min(max(vmem_est, 32 << 20), 48 << 20))

    def full(shape):
        return pl.BlockSpec(shape, lambda i: (0, 0))

    out = pl.pallas_call(
        _pe_kernel,
        out_shape=jax.ShapeDtypeStruct((Mp, Ep), out_dtype),
        grid=grid,
        in_specs=[
            pl.BlockSpec((tile_r, Cp), lambda i: (i, 0)),   # packed xyz tile
            full(w1b.shape),                                # w1 (BN-folded, block-diag)
            full(b1b.shape),                                # b1 (BN-folded, tiled)
            full(w2b.shape),                                # w2 (block-diag)
            full(b2b.shape),                                # b2 (tiled)
        ],
        out_specs=pl.BlockSpec((tile_r, Ep), lambda i: (i, 0)),
        compiler_params=pltpu.CompilerParams(
            dimension_semantics=("parallel",),              # megacore sharding
            vmem_limit_bytes=vmem_limit,
        ),
    )(x2d, w1b, b1b, w2b, b2b)

    out = out.reshape(Mtot, E)[:M]                  # drop padded dummy points
    return out.reshape(B, N, E)


def learned_abs_pe_3d(xyz, prepared, *, tile_m=32768, out_dtype=None):
    """xyz: (B, N, 3) channels-last -> (B, N, E).

    `prepared` is the (pack, weights) tuple from prepare_params().
    `out_dtype` (e.g. jnp.bfloat16) keeps f32 accumulation in-kernel but
    halves the dominant HBM write stream.
    """
    pack, p = prepared
    return _pe_forward(xyz, p["w1"], p["b1"], p["w2"], p["b2"],
                       pack=pack, tile_m=tile_m, out_dtype=out_dtype)


def reference_forward(xyz, params):
    """Pure-JAX reference of the same (eval-mode) forward, unfolded params."""
    x = xyz.astype(jnp.float32)
    h = jnp.einsum("bnc,ce->bne", x, params["w1"]) + params["b1"]
    inv = jax.lax.rsqrt(params["var"] + BN_EPS)
    h = (h - params["mu"]) * inv * params["gamma"] + params["beta"]
    h = jnp.maximum(h, 0.0)
    out = jnp.einsum("bne,ef->bnf", h, params["w2"]) + params["b2"]
    return out.astype(jnp.float32)


def make_params(key, input_dim, embedding_dim):
    ks = jax.random.split(key, 6)
    E = embedding_dim
    return {
        # Conv1d(3, E, k=1): torch weight (E, 3, 1) stored transposed as (3, E)
        "w1": jax.random.uniform(ks[0], (input_dim, E), jnp.float32, -0.5, 0.5),
        "b1": jax.random.uniform(ks[1], (1, E), jnp.float32, -0.1, 0.1),
        # BatchNorm1d(E) parameters + (synthetic) running stats
        "gamma": 1.0 + 0.1 * jax.random.normal(ks[2], (1, E), jnp.float32),
        "beta": 0.1 * jax.random.normal(ks[3], (1, E), jnp.float32),
        "mu": 0.05 * jax.random.normal(ks[4], (1, E), jnp.float32),
        "var": jnp.ones((1, E), jnp.float32) * 0.9,
        # Conv1d(E, E, k=1): torch weight (E, E, 1) stored transposed as (E, E)
        "w2": jax.random.uniform(ks[5], (E, E), jnp.float32, -0.2, 0.2),
        "b2": jnp.linspace(-0.05, 0.05, E, dtype=jnp.float32).reshape(1, E),
    }


if __name__ == "__main__":
    INPUT_DIM = 3         # (x, y, z)
    EMBED_DIM = 32

    key = jax.random.PRNGKey(0)
    k_x, k_p, k_x2, k_x3 = jax.random.split(key, 4)
    params = make_params(k_p, INPUT_DIM, EMBED_DIM)
    prepared = prepare_params(params)             # one-time weight prep (hoisted)

    # 1) Small case (single grid step, block == full array).
    B, N = 2, 64
    xyz = jax.random.normal(k_x, (B, N, INPUT_DIM), jnp.float32)
    out = jax.block_until_ready(learned_abs_pe_3d(xyz, prepared))
    ref = reference_forward(xyz, params)
    assert out.shape == (B, N, EMBED_DIM), out.shape
    assert jnp.allclose(out, ref, atol=1e-4, rtol=1e-4), \
        float(jnp.max(jnp.abs(out - ref)))

    # 2) Moderate case, default (large) tile -> single step, Mp = 2250.
    B2, N2 = 3, 3000
    xyz2 = jax.random.normal(k_x2, (B2, N2, INPUT_DIM), jnp.float32)
    ref2 = reference_forward(xyz2, params)
    out2 = jax.block_until_ready(learned_abs_pe_3d(xyz2, prepared))
    assert out2.shape == (B2, N2, EMBED_DIM), out2.shape
    assert jnp.allclose(out2, ref2, atol=1e-4, rtol=1e-4), \
        float(jnp.max(jnp.abs(out2 - ref2)))

    # 2b) Same data with a small tile -> multi-step grid + ragged last block.
    out2r = jax.block_until_ready(learned_abs_pe_3d(xyz2, prepared, tile_m=2048))
    assert jnp.allclose(out2r, ref2, atol=1e-4, rtol=1e-4), \
        float(jnp.max(jnp.abs(out2r - ref2)))

    # 3) M not a multiple of pack -> host-side padding path (no pack=1 cliff).
    B3, N3 = 1, 131
    xyz3 = jax.random.normal(k_x3, (B3, N3, INPUT_DIM), jnp.float32)
    out3 = jax.block_until_ready(learned_abs_pe_3d(xyz3, prepared))
    ref3 = reference_forward(xyz3, params)
    assert out3.shape == (B3, N3, EMBED_DIM), out3.shape
    assert jnp.allclose(out3, ref3, atol=1e-4, rtol=1e-4), \
        float(jnp.max(jnp.abs(out3 - ref3)))

    # 4) bf16 output path (f32 accumulation, cast at store) — loose tolerance.
    out_bf = jax.block_until_ready(
        learned_abs_pe_3d(xyz2, prepared, out_dtype=jnp.bfloat16))
    assert out_bf.dtype == jnp.bfloat16
    assert jnp.allclose(out_bf.astype(jnp.float32), ref2, atol=5e-2, rtol=5e-2), \
        float(jnp.max(jnp.abs(out_bf.astype(jnp.float32) - ref2)))

    print("KERNEL_OK")
</pallas_src>

<mosaic_0001>
module attributes {stable_mosaic.version = 11 : i64} {
  func.func @_pe_kernel(%arg0: i32, %arg1: memref<32x12xf32, #tpu.memory_space<vmem>>, %arg2: memref<12x128xf32, #tpu.memory_space<vmem>>, %arg3: memref<1x128xf32, #tpu.memory_space<vmem>>, %arg4: memref<128x128xf32, #tpu.memory_space<vmem>>, %arg5: memref<1x128xf32, #tpu.memory_space<vmem>>, %arg6: memref<32x128xf32, #tpu.memory_space<vmem>>) attributes {dimension_semantics = [#tpu.dimension_semantics<parallel>], iteration_bounds = array<i64: 1>, scalar_prefetch = 0 : i64, scratch_operands = 0 : i64, tpu.core_type = #tpu.core_type<tc>, window_params = [{transform_indices = @transform_0, window_bounds = array<i64: 32, 12>}, {pipeline_mode = #tpu.pipeline_mode<synchronous>, transform_indices = @transform_1, window_bounds = array<i64: 12, 128>}, {pipeline_mode = #tpu.pipeline_mode<synchronous>, transform_indices = @transform_2, window_bounds = array<i64: 1, 128>}, {pipeline_mode = #tpu.pipeline_mode<synchronous>, transform_indices = @transform_3, window_bounds = array<i64: 128, 128>}, {pipeline_mode = #tpu.pipeline_mode<synchronous>, transform_indices = @transform_4, window_bounds = array<i64: 1, 128>}, {transform_indices = @transform_5, window_bounds = array<i64: 32, 128>}]} {
    %c0 = arith.constant 0 : index
    %c0_0 = arith.constant 0 : index
    %0 = vector.load %arg1[%c0, %c0_0] : memref<32x12xf32, #tpu.memory_space<vmem>>, vector<32x12xf32>
    %c0_1 = arith.constant 0 : index
    %c0_2 = arith.constant 0 : index
    %1 = vector.load %arg2[%c0_1, %c0_2] : memref<12x128xf32, #tpu.memory_space<vmem>>, vector<12x128xf32>
    %cst = arith.constant dense<0.000000e+00> : vector<32x128xf32>
    %2 = tpu.matmul %0, %1, %cst {dimension_numbers = #tpu.dot_dimension_numbers<[1], [0], [0], [1], [0, 0, 1, 1], [], []>} : vector<32x12xf32>, vector<12x128xf32>, vector<32x128xf32> -> vector<32x128xf32>
    %c0_3 = arith.constant 0 : index
    %c0_4 = arith.constant 0 : index
    %3 = vector.load %arg3[%c0_3, %c0_4] : memref<1x128xf32, #tpu.memory_space<vmem>>, vector<1x128xf32>
    %4 = vector.broadcast %3 : vector<1x128xf32> to vector<32x128xf32>
    %5 = arith.addf %2, %4 : vector<32x128xf32>
    %cst_5 = arith.constant 0.000000e+00 : f32
    %6 = vector.broadcast %cst_5 : f32 to vector<32x128xf32>
    %7 = arith.maximumf %5, %6 : vector<32x128xf32>
    %c0_6 = arith.constant 0 : index
    %c0_7 = arith.constant 0 : index
    %8 = vector.load %arg4[%c0_6, %c0_7] : memref<128x128xf32, #tpu.memory_space<vmem>>, vector<128x128xf32>
    %cst_8 = arith.constant dense<0.000000e+00> : vector<32x128xf32>
    %9 = tpu.matmul %7, %8, %cst_8 {dimension_numbers = #tpu.dot_dimension_numbers<[1], [0], [0], [1], [0, 0, 1, 1], [], []>} : vector<32x128xf32>, vector<128x128xf32>, vector<32x128xf32> -> vector<32x128xf32>
    %c0_9 = arith.constant 0 : index
    %c0_10 = arith.constant 0 : index
    %10 = vector.load %arg5[%c0_9, %c0_10] : memref<1x128xf32, #tpu.memory_space<vmem>>, vector<1x128xf32>
    %11 = vector.broadcast %10 : vector<1x128xf32> to vector<32x128xf32>
    %12 = arith.addf %9, %11 : vector<32x128xf32>
    %c0_11 = arith.constant 0 : index
    %c0_12 = arith.constant 0 : index
    %13 = vector.load %arg6[%c0_11, %c0_12] : memref<32x128xf32, #tpu.memory_space<vmem>>, vector<32x128xf32>
    tpu.vector_store %arg6[%c0_11, %c0_12], %12 {strides = array<i32>} : memref<32x128xf32, #tpu.memory_space<vmem>>, vector<32x128xf32>,
    return
  }
  func.func @transform_0(%arg0: i32) -> (i32, i32) {
    %c0_i32 = arith.constant 0 : i32
    %c0_i32_0 = arith.constant 0 : i32
    return %arg0, %c0_i32 : i32, i32
  }
  func.func @transform_1(%arg0: i32) -> (i32, i32) {
    %c0_i32 = arith.constant 0 : i32
    %c0_i32_0 = arith.constant 0 : i32
    %c0_i32_1 = arith.constant 0 : i32
    return %c0_i32, %c0_i32_0 : i32, i32
  }
  func.func @transform_2(%arg0: i32) -> (i32, i32) {
    %c0_i32 = arith.constant 0 : i32
    %c0_i32_0 = arith.constant 0 : i32
    %c0_i32_1 = arith.constant 0 : i32
    return %c0_i32, %c0_i32_0 : i32, i32
  }
  func.func @transform_3(%arg0: i32) -> (i32, i32) {
    %c0_i32 = arith.constant 0 : i32
    %c0_i32_0 = arith.constant 0 : i32
    %c0_i32_1 = arith.constant 0 : i32
    return %c0_i32, %c0_i32_0 : i32, i32
  }
  func.func @transform_4(%arg0: i32) -> (i32, i32) {
    %c0_i32 = arith.constant 0 : i32
    %c0_i32_0 = arith.constant 0 : i32
    %c0_i32_1 = arith.constant 0 : i32
    return %c0_i32, %c0_i32_0 : i32, i32
  }
  func.func @transform_5(%arg0: i32) -> (i32, i32) {
    %c0_i32 = arith.constant 0 : i32
    %c0_i32_0 = arith.constant 0 : i32
    return %arg0, %c0_i32 : i32, i32
  }
}

</mosaic_0001>

<bundles_post_ra>
// kernel: _pe_forward.1
= control target key start
LH: loop header
LB: loop body
LE: loop exit
PB: predicated region body
PF: predicated region fallthrough
CT: control target
= control target key end

     0   :  { %vm46_vm0 = vcmask 1043456   ;;  %vm33_vm1 = vcmask 97280   ;;  %vm375_vm2 = vmmov 1   ;;  %s494_s1 = inlined_call_operand.vmem [shape: f32[12,128], index: 1, kind: input, shape index: {}]   ;;  %s495_s0 = inlined_call_operand.vmem [shape: f32[32,12], index: 0, kind: input, shape index: {}]   ;;  %s496_s3 = inlined_call_operand.vmem [shape: f32[128,128], index: 3, kind: input, shape index: {}]   ;;  %s497_s2 = inlined_call_operand.vmem [shape: f32[1,128], index: 2, kind: input, shape index: {}]   ;;  %s498_s4 = inlined_call_operand.vmem [shape: f32[1,128], index: 4, kind: input, shape index: {}]   ;;  %s499_s5 = inlined_call_operand.vmem [shape: f32[32,128], index: 5, kind: output, shape index: {}]  }
   0x1   :  { %v24_v0 = vld [vmem:[%s494_s1] sm:$0xff]  ;;  %v25_v1 = vld [vmem:[%s494_s1 + $0x8] sm:$0xf]  ;;  %vm337_vm3 = vmpackc.low %vm46_vm0, %vm375_vm2 }
   0x2   :  { %v336_v2 = vpack.c.bf16 %v25_v1, %v24_v0  ;;  %v20_v3 = vld [vmem:[%s495_s0] sm:$0xff]  ;;  %v140_v5 = vld [vmem:[%s496_s3 + $0x8] sm:$0xff]  ;;  %v141_v7 = vld [vmem:[%s496_s3 + $0x10] sm:$0xff] }
   0x3   :  { %292 = vmatprep.mubr.msk.f32.mxu0 %vm33_vm1, %v20_v3  ;;  %v139_v4 = vld [vmem:[%s496_s3] sm:$0xff]  ;;  %v142_v8 = vld [vmem:[%s496_s3 + $0x18] sm:$0xff]  ;;  %v21_v9 = vld [vmem:[%s495_s0 + $0x8] sm:$0xff] }
   0x4   :  { %338 = vmatprep.subr.msk.bf16.mxu0 %vm337_vm3, %v336_v2  ;;  %v342_v6 = vpack.c.bf16 %v140_v5, %v139_v4  ;;  %v346_v10 = vpack.c.bf16 %v142_v8, %v141_v7  ;;  %v143_v11 = vld [vmem:[%s496_s3 + $0x20] sm:$0xff]  ;;  %v144_v12 = vld [vmem:[%s496_s3 + $0x28] sm:$0xff]  ;;  %v22_v13 = vld [vmem:[%s495_s0 + $0x10] sm:$0xff] }
   0x5   :  { %341 = vmatpush3.bf16.msk.msra.mxu0 %vm337_vm3, %v336_v2  ;;  %v350_v14 = vpack.c.bf16 %v144_v12, %v143_v11  ;;  %v23_v15 = vld [vmem:[%s495_s0 + $0x18] sm:$0xff]  ;;  %v145_v16 = vld [vmem:[%s496_s3 + $0x30] sm:$0xff]  ;;  %v147_v19 = vld [vmem:[%s496_s3 + $0x40] sm:$0xff] }
   0x6   :  { %343 = vmatprep.subr.bf16.mxu1 %v342_v6  ;;  %v146_v17 = vld [vmem:[%s496_s3 + $0x38] sm:$0xff]  ;;  %v148_v20 = vld [vmem:[%s496_s3 + $0x48] sm:$0xff]  ;;  %v149_v22 = vld [vmem:[%s496_s3 + $0x50] sm:$0xff] }
   0x7   :  { %345 = vmatpush3.bf16.msra.mxu1 %v342_v6  ;;  %v354_v18 = vpack.c.bf16 %v146_v17, %v145_v16  ;;  %v358_v21 = vpack.c.bf16 %v148_v20, %v147_v19  ;;  %v150_v23 = vld [vmem:[%s496_s3 + $0x58] sm:$0xff]  ;;  %v151_v25 = vld [vmem:[%s496_s3 + $0x60] sm:$0xff]  ;;  %v152_v26 = vld [vmem:[%s496_s3 + $0x68] sm:$0xff] }
   0x8   :  { %293 = vmatmul.mubr.msk.f32.vlgmr.msra.gmra.mrb[0].mxu0 %vm33_vm1, %v21_v9  ;;  %347 = vmatprep.subr.bf16.mxu1 %v346_v10  ;;  %v362_v24 = vpack.c.bf16 %v150_v23, %v149_v22  ;;  %v366_v27 = vpack.c.bf16 %v152_v26, %v151_v25  ;;  %v153_v28 = vld [vmem:[%s496_s3 + $0x70] sm:$0xff]  ;;  %v154_v29 = vld [vmem:[%s496_s3 + $0x78] sm:$0xff]  ;;  %v255_v31 = vld [vmem:[%s497_s2] ss:$0 sm:$0xff] }
   0x9   :  { %295 = vmatprep.mubr.msk.f32.mxu0 %vm33_vm1, %v22_v13  ;;  %v370_v30 = vpack.c.bf16 %v154_v29, %v153_v28  ;;  %v261_v44 = vld [vmem:[%s498_s4] ss:$0 sm:$0xff] }
   0xb   :  { %349 = vmatpush3.bf16.msra.mxu1 %v346_v10 }
   0xc   :  { %296 = vmatmul.mubr.msk.f32.gmra.mrb[2].mxu0 %vm33_vm1, %v23_v15  ;;  %351 = vmatprep.subr.bf16.mxu1 %v350_v14 }
   0xf   :  { %353 = vmatpush3.bf16.msra.mxu1 %v350_v14 }
  0x10   :  { %355 = vmatprep.subr.bf16.mxu1 %v354_v18 }
  0x13   :  { %357 = vmatpush3.bf16.msra.mxu1 %v354_v18 }
  0x14   :  { %359 = vmatprep.subr.bf16.mxu1 %v358_v21 }
  0x17   :  { %361 = vmatpush3.bf16.msra.mxu1 %v358_v21 }
  0x18   :  { %363 = vmatprep.subr.bf16.mxu1 %v362_v24 }
  0x1b   :  { %365 = vmatpush3.bf16.msra.mxu1 %v362_v24 }
  0x1c   :  { %367 = vmatprep.subr.bf16.mxu1 %v366_v27 }
  0x1f   :  { %369 = vmatpush3.bf16.msra.mxu1 %v366_v27 }
  0x20   :  { %371 = vmatprep.subr.bf16.mxu1 %v370_v30 }
  0x23   :  { %373 = vmatpush3.bf16.msra.mxu1 %v370_v30 }
  0xdb   :  { %v294_v32 = vpop.f32.mrb[0].mxu0 }
  0xdc   :  { %v122_v33 = vadd.f32 %v294_v32, %v255_v31  ;;  %v116_v34 = vpop.f32.mrb[1].mxu0 }
  0xdd   :  { %v117_v35 = vadd.f32 %v255_v31, %v116_v34 }
  0xde   :  { %v136_v38 = vmax.f32 %v122_v33, 0.0 }
  0xdf   :  { %v297_v36 = vpop.f32.mrb[2].mxu0  ;;  %v135_v37 = vmax.f32 %v117_v35, 0.0 }
  0xe0   :  { %v132_v39 = vadd.f32 %v297_v36, %v255_v31  ;;  %v126_v40 = vpop.f32.mrb[3].mxu0 }
  0xe1   :  { %v127_v41 = vadd.f32 %v255_v31, %v126_v40  ;;  %330 = vmatprep.mubr.f32.mxu1 %v135_v37 }
  0xe2   :  { %331 = vmatmul.mubr.f32.vlgmr.msra.gmra.mrb[0].mxu1 %v136_v38  ;;  %v138_v43 = vmax.f32 %v132_v39, 0.0 }
  0xe3   :  { %v137_v42 = vmax.f32 %v127_v41, 0.0 }
  0xe5   :  { %333 = vmatprep.mubr.f32.mxu1 %v137_v42 }
  0xe6   :  { %334 = vmatmul.mubr.f32.gmra.mrb[2].mxu1 %v138_v43 }
 0x1b5   :  { %v332_v45 = vpop.f32.mrb[0].mxu1 }
 0x1b6   :  { %v234_v46 = vadd.f32 %v332_v45, %v261_v44  ;;  %v228_v47 = vpop.f32.mrb[1].mxu1 }
 0x1b7   :  { %v229_v48 = vadd.f32 %v261_v44, %v228_v47 }
 0x1b8   :  { %248 = vst [vmem:[%s499_s5 + $0x8] sm:$0xff] %v234_v46 }
 0x1b9   :  { %247 = vst [vmem:[%s499_s5] sm:$0xff] %v229_v48  ;;  %v335_v49 = vpop.f32.mrb[2].mxu1 }
 0x1ba   :  { %v244_v50 = vadd.f32 %v335_v49, %v261_v44  ;;  %v238_v51 = vpop.f32.mrb[3].mxu1 }
 0x1bb   :  { %v239_v52 = vadd.f32 %v261_v44, %v238_v51 }
 0x1bc   :  { %250 = vst [vmem:[%s499_s5 + $0x18] sm:$0xff] %v244_v50 }
 0x1bd   :  { %249 = vst [vmem:[%s499_s5 + $0x10] sm:$0xff] %v239_v52 }

</bundles_post_ra>
